<compile_context>
chip_gen: v5e
topology: v5e:2x2
jax: 0.10.0
libtpu: 0.0.40
codegen_flags: <defaults>
</compile_context>

<pallas_src>
import functools

import jax
import jax.numpy as jnp
from jax.experimental import pallas as pl
from jax.experimental.pallas import tpu as pltpu


def _contrastive_tile_kernel(x0_ref, x1_ref, y_ref, out_ref, *,
                             margin, batch, tile_b, inv_scale):
    # x0_ref / x1_ref: (TB, D) in the HBM dtype (f32 or bf16); y_ref: (TB, 1) f32.
    x0 = x0_ref[...].astype(jnp.float32)
    x1 = x1_ref[...].astype(jnp.float32)
    y = y_ref[...]                                             # (TB, 1)

    diff = x0 - x1
    dist_sq = jnp.sum(diff * diff, axis=1, keepdims=True)      # (TB, 1)  XLU reduce
    dist = jnp.sqrt(dist_sq)                                   # EUP
    clamped = jnp.maximum(margin - dist, 0.0)                  # (TB, 1)
    loss_per = y * dist_sq + (1.0 - y) * (clamped * clamped)   # (TB, 1)

    # Mask rows that fall past the real batch (tail tile padding).
    row = jax.lax.broadcasted_iota(jnp.int32, loss_per.shape, 0)
    global_row = pl.program_id(0) * tile_b + row
    loss_per = jnp.where(global_row < batch, loss_per, 0.0)

    # One partial scalar per tile, pre-scaled by 1/(2*B).
    out_ref[...] = (jnp.sum(loss_per) * inv_scale).reshape(1, 1, 1)


def _pick_tile_b(b, d, itemsize):
    """Tile rows: multiple of 8, >= 8, <= 512, and 2 inputs x 2 buffers fit ~16 MiB."""
    vmem_budget = 16 * 1024 * 1024
    max_tb = vmem_budget // (4 * d * itemsize)           # 2 inputs x 2 pipeline bufs
    max_tb = max(8, (max_tb // 8) * 8)
    b_cap = max(8, (b // 8) * 8)
    return min(512, b_cap, max_tb)


def contrastive_loss(x0, x1, y, margin=1.0):
    """Pallas equivalent of ContrastiveLoss(margin).forward(x0, x1, y)."""
    assert x0.shape == x1.shape and x0.ndim == 2
    b, d = x0.shape

    # Keep bf16 features bf16 in HBM (bandwidth win); everything else -> f32.
    if not (x0.dtype == jnp.bfloat16 and x1.dtype == jnp.bfloat16):
        x0 = x0.astype(jnp.float32)
        x1 = x1.astype(jnp.float32)
    y2d = jnp.asarray(y, jnp.float32).reshape(b, 1)

    tb = _pick_tile_b(b, d, jnp.dtype(x0.dtype).itemsize)
    num_tiles = pl.cdiv(b, tb)
    inv_scale = 1.0 / (2.0 * b)

    kernel = functools.partial(
        _contrastive_tile_kernel,
        margin=float(margin), batch=b, tile_b=tb, inv_scale=inv_scale)

    partials = pl.pallas_call(
        kernel,
        out_shape=jax.ShapeDtypeStruct((num_tiles, 1, 1), jnp.float32),
        grid=(num_tiles,),
        in_specs=[
            pl.BlockSpec((tb, d), lambda i: (i, 0)),
            pl.BlockSpec((tb, d), lambda i: (i, 0)),
            pl.BlockSpec((tb, 1), lambda i: (i, 0)),
        ],
        out_specs=pl.BlockSpec((1, 1, 1), lambda i: (i, 0, 0)),
        compiler_params=pltpu.CompilerParams(
            dimension_semantics=("parallel",),
            vmem_limit_bytes=32 * 1024 * 1024,
        ),
    )(x0, x1, y2d)

    # Partial sums are already scaled by 1/(2B); just add them up.
    return jnp.sum(partials)


def _reference(x0, x1, y, margin=1.0):
    diff = x0.astype(jnp.float32) - x1.astype(jnp.float32)
    dist_sq = jnp.sum(diff ** 2, axis=1)
    dist = jnp.sqrt(dist_sq)
    mdist = margin - dist
    dist_c = jnp.maximum(mdist, 0.0)
    loss = y * dist_sq + (1 - y) * dist_c ** 2
    return jnp.sum(loss) / 2.0 / x0.shape[0]


if __name__ == "__main__":
    key = jax.random.PRNGKey(0)

    # Case 1: small, tile-aligned (matches the module's typical (B, D) usage).
    k0, k1, k2, k3, k4, k5 = jax.random.split(key, 6)
    B, D = 8, 32
    x0 = jax.random.normal(k0, (B, D), dtype=jnp.float32)
    x1 = jax.random.normal(k1, (B, D), dtype=jnp.float32)
    y = jax.random.bernoulli(k2, 0.5, (B,)).astype(jnp.float32)

    out = contrastive_loss(x0, x1, y, margin=1.0)
    out = jax.block_until_ready(out)
    ref = _reference(x0, x1, y, margin=1.0)
    assert jnp.allclose(out, ref, rtol=1e-5, atol=1e-5), (out, ref)

    # Case 2: B not a multiple of the tile size (exercises tail-row masking).
    B2, D2 = 20, 160
    x0b = jax.random.normal(k3, (B2, D2), dtype=jnp.float32)
    x1b = jax.random.normal(k4, (B2, D2), dtype=jnp.float32)
    yb = jax.random.bernoulli(k5, 0.5, (B2,)).astype(jnp.float32)

    out2 = contrastive_loss(x0b, x1b, yb, margin=1.0)
    out2 = jax.block_until_ready(out2)
    ref2 = _reference(x0b, x1b, yb, margin=1.0)
    assert jnp.allclose(out2, ref2, rtol=1e-5, atol=1e-5), (out2, ref2)

    print("KERNEL_OK")
</pallas_src>

<mosaic_0001>
module attributes {stable_mosaic.version = 11 : i64} {
  func.func @_contrastive_tile_kernel(%arg0: i32, %arg1: memref<8x32xf32, #tpu.memory_space<vmem>>, %arg2: memref<8x32xf32, #tpu.memory_space<vmem>>, %arg3: memref<8x1xf32, #tpu.memory_space<vmem>>, %arg4: memref<1x1x1xf32, #tpu.memory_space<vmem>>) attributes {dimension_semantics = [#tpu.dimension_semantics<parallel>], iteration_bounds = array<i64: 1>, scalar_prefetch = 0 : i64, scratch_operands = 0 : i64, tpu.core_type = #tpu.core_type<tc>, window_params = [{transform_indices = @transform_0, window_bounds = array<i64: 8, 32>}, {transform_indices = @transform_1, window_bounds = array<i64: 8, 32>}, {transform_indices = @transform_2, window_bounds = array<i64: 8, 1>}, {transform_indices = @transform_3, window_bounds = array<i64: 1, 1, 1>}]} {
    %c0 = arith.constant 0 : index
    %c0_0 = arith.constant 0 : index
    %0 = vector.load %arg1[%c0, %c0_0] : memref<8x32xf32, #tpu.memory_space<vmem>>, vector<8x32xf32>
    %c0_1 = arith.constant 0 : index
    %c0_2 = arith.constant 0 : index
    %1 = vector.load %arg2[%c0_1, %c0_2] : memref<8x32xf32, #tpu.memory_space<vmem>>, vector<8x32xf32>
    %c0_3 = arith.constant 0 : index
    %c0_4 = arith.constant 0 : index
    %2 = vector.load %arg3[%c0_3, %c0_4] : memref<8x1xf32, #tpu.memory_space<vmem>>, vector<8x1xf32>
    %3 = arith.subf %0, %1 : vector<8x32xf32>
    %4 = arith.mulf %3, %3 : vector<8x32xf32>
    %cst = arith.constant dense<0.000000e+00> : vector<8xf32>
    %5 = vector.multi_reduction <add>, %4, %cst [1] : vector<8x32xf32> to vector<8xf32>
    %6 = vector.shape_cast %5 : vector<8xf32> to vector<8x1xf32>
    %7 = math.sqrt %6 : vector<8x1xf32>
    %cst_5 = arith.constant 1.000000e+00 : f32
    %8 = vector.broadcast %cst_5 : f32 to vector<8x1xf32>
    %9 = arith.subf %8, %7 : vector<8x1xf32>
    %cst_6 = arith.constant 0.000000e+00 : f32
    %10 = vector.broadcast %cst_6 : f32 to vector<8x1xf32>
    %11 = arith.maximumf %9, %10 : vector<8x1xf32>
    %12 = arith.mulf %2, %6 : vector<8x1xf32>
    %cst_7 = arith.constant 1.000000e+00 : f32
    %13 = vector.broadcast %cst_7 : f32 to vector<8x1xf32>
    %14 = arith.subf %13, %2 : vector<8x1xf32>
    %15 = arith.mulf %11, %11 : vector<8x1xf32>
    %16 = arith.mulf %14, %15 : vector<8x1xf32>
    %17 = arith.addf %12, %16 : vector<8x1xf32>
    %18 = tpu.iota {dimensions = array<i32: 0>} : vector<8x1xi32>
    %c8_i32 = arith.constant 8 : i32
    %19 = arith.muli %arg0, %c8_i32 : i32
    %20 = vector.broadcast %19 : i32 to vector<8x1xi32>
    %21 = arith.addi %20, %18 : vector<8x1xi32>
    %c8_i32_8 = arith.constant 8 : i32
    %22 = vector.broadcast %c8_i32_8 : i32 to vector<8x1xi32>
    %23 = arith.cmpi slt, %21, %22 : vector<8x1xi32>
    %cst_9 = arith.constant 0.000000e+00 : f32
    %24 = vector.broadcast %cst_9 : f32 to vector<8x1xf32>
    %25 = arith.select %23, %17, %24 : vector<8x1xi1>, vector<8x1xf32>
    %26 = vector.shape_cast %25 : vector<8x1xf32> to vector<1x8x1xf32>
    %cst_10 = arith.constant dense<0.000000e+00> : vector<1xf32>
    %27 = vector.multi_reduction <add>, %26, %cst_10 [1, 2] : vector<1x8x1xf32> to vector<1xf32>
    %28 = vector.shape_cast %27 : vector<1xf32> to vector<1x1x1xf32>
    %29 = vector.extract %28[0, 0, 0] : f32 from vector<1x1x1xf32>
    %cst_11 = arith.constant 6.250000e-02 : f32
    %30 = arith.mulf %29, %cst_11 : f32
    %31 = vector.broadcast %30 : f32 to vector<1x1x1xf32>
    %c0_12 = arith.constant 0 : index
    %c0_13 = arith.constant 0 : index
    %c0_14 = arith.constant 0 : index
    %32 = vector.load %arg4[%c0_12, %c0_13, %c0_14] : memref<1x1x1xf32, #tpu.memory_space<vmem>>, vector<1x1x1xf32>
    tpu.vector_store %arg4[%c0_12, %c0_13, %c0_14], %31 {strides = array<i32>} : memref<1x1x1xf32, #tpu.memory_space<vmem>>, vector<1x1x1xf32>,
    return
  }
  func.func @transform_0(%arg0: i32) -> (i32, i32) {
    %c0_i32 = arith.constant 0 : i32
    %c0_i32_0 = arith.constant 0 : i32
    return %arg0, %c0_i32 : i32, i32
  }
  func.func @transform_1(%arg0: i32) -> (i32, i32) {
    %c0_i32 = arith.constant 0 : i32
    %c0_i32_0 = arith.constant 0 : i32
    return %arg0, %c0_i32 : i32, i32
  }
  func.func @transform_2(%arg0: i32) -> (i32, i32) {
    %c0_i32 = arith.constant 0 : i32
    %c0_i32_0 = arith.constant 0 : i32
    return %arg0, %c0_i32 : i32, i32
  }
  func.func @transform_3(%arg0: i32) -> (i32, i32, i32) {
    %c0_i32 = arith.constant 0 : i32
    %c0_i32_0 = arith.constant 0 : i32
    %c0_i32_1 = arith.constant 0 : i32
    return %arg0, %c0_i32, %c0_i32_0 : i32, i32, i32
  }
}

</mosaic_0001>

<bundles_post_ra>
// kernel: tpu_custom_call.1
= control target key start
LH: loop header
LB: loop body
LE: loop exit
PB: predicated region body
PF: predicated region fallthrough
CT: control target
= control target key end

     0   :  { %8 = vsyncpa [#allocation3], 0  ;;  %s188_s0 = inlined_call_operand.vmem [shape: f32[8,32], index: 0, kind: input, shape index: {}]   ;;  %s189_s1 = inlined_call_operand.hbm [shape: f32[8,32], index: 1, kind: input, shape index: {}]   ;;  %s190_s2 = inlined_call_operand.vmem [shape: f32[8,1], index: 2, kind: input, shape index: {}]   ;;  %s191_s3 = inlined_call_operand.hbm [shape: f32[1,1,1], index: 3, kind: output, shape index: {}]  }
   0x1   :  { %9 = vsyncpa [#allocation4], 0  ;;  %s17_s14 = sshll.u32 %s189_s1, 4  ;;  %s154_s15 = smov [#allocation2]   ;;  %s18_s14 = int_to_ptr.hbm [resolvable:$true] %s17_s14 }
   0x2   :  { %s19_s16 = sshll.u32 %s154_s15, 4  ;;  %s20_s16 = int_to_ptr.vmem [resolvable:$true] %s19_s16 }
   0x3   :  { %22 = dma.hbm_to_vmem [thread:$0]  %s18_s14, 128, %s20_s16, [#allocation3]  }
   0x4   :  { %150 = dma.done.wait [#allocation3], 128  }
   0x5   :  { %151 = vsyncadd [#allocation3], 4294967168  ;;  %v29_v0 = vld [vmem:[%s188_s0] sm:$0xff]  ;;  %vm34_vm0 = vcmask 261120   ;;  %vm64_vm3 = vcmask 7168   ;;  %s155_s19 = smov [#allocation5]  }
   0x6   :  { %v30_v1 = vld [vmem:[#allocation2] sm:$0xff]  ;;  %s84_s20 = sshll.u32 %s155_s19, 4  ;;  %s86_s22 = sshll.u32 %s191_s3, 4  ;;  %vm77_vm4 = vcmask 0   ;;  %s85_s20 = int_to_ptr.vmem [resolvable:$true] %s84_s20  ;;  %s87_s22 = int_to_ptr.hbm [resolvable:$true] %s86_s22 }
   0x7   :  { %v32_v2 = vsub.f32 %v29_v0, %v30_v1  ;;  %v31_v17 = vld [vmem:[%s190_s2] sm:$0xff] }
   0x8   :  { %v53_v19 = vsub.f32 1.0, %v31_v17 }
   0x9   :  { %v33_v3 = vmul.f32 %v32_v2, %v32_v2 }
   0xb   :  { %v35_v4 = vsel %vm34_vm0, %v33_v3, 0.0 }
   0xc   :  { %36 = vadd.xlane.f32.xlu0 %v35_v4 }
  0x7f   :  { %v37_v5 = vpop.xlane.xlu0 %36 }
  0x80   :  { %100 = vrsqrt.f32 %v37_v5  ;;  %vm45_vm1 = vcmp.eq.f32.partialorder %v37_v5, inf  ;;  %v48_v13 = vand.u32 2147483648, %v37_v5  ;;  %vm47_vm2 = vcmp.eq.f32.partialorder %v37_v5, 0.0 }
  0x81   :  { %v52_v21 = vmul.f32 %v37_v5, %v31_v17 }
  0x86   :  { %v101_v6 = vpop.eup %100 }
  0x87   :  { %v39_v7 = vmul.f32 %v101_v6, %v37_v5 }
  0x89   :  { %v40_v8 = vmul.f32 %v101_v6, %v39_v7 }
  0x8b   :  { %v41_v9 = vmul.f32 0.5, %v40_v8 }
  0x8d   :  { %v42_v10 = vsub.f32 1.5, %v41_v9 }
  0x8f   :  { %v43_v11 = vmul.f32 %v101_v6, %v42_v10 }
  0x91   :  { %v44_v12 = vmul.f32 %v43_v11, %v37_v5 }
  0x93   :  { %v46_v14 = vsel %vm45_vm1, %v37_v5, %v44_v12 }
  0x94   :  { %v49_v15 = vsel %vm47_vm2, %v48_v13, %v46_v14 }
  0x95   :  { %v50_v16 = vsub.f32 1.0, %v49_v15 }
  0x97   :  { %v51_v18 = vmax.f32 %v50_v16, 0.0 }
  0x99   :  { %v54_v20 = vmul.f32 %v51_v18, %v51_v18 }
  0x9b   :  { %v55_v22 = vmul.f32 %v54_v20, %v53_v19 }
  0x9d   :  { %v56_v23 = vadd.f32 %v55_v22, %v52_v21 }
  0x9f   :  { %v65_v24 = vsel %vm64_vm3, %v56_v23, 0.0 }
  0xa0   :  { %66 = vadd.xlane.f32.xlu0 %v65_v24 }
 0x113   :  { %v67_v25 = vpop.xlane.xlu0 %66 }
 0x114   :  { %v68_v26 = vrot.slane %v67_v25, 4 }
 0x116   :  { %v69_v27 = vadd.f32 %v68_v26, %v67_v25 }
 0x118   :  { %v70_v28 = vrot.slane %v69_v27, 2 }
 0x11a   :  { %v71_v29 = vadd.f32 %v70_v28, %v69_v27 }
 0x11c   :  { %v72_v30 = vrot.slane %v71_v29, 1 }
 0x11e   :  { %v73_v31 = vadd.f32 %v72_v30, %v71_v29 }
 0x120   :  { %96 = vpush %v73_v31 }
 0x151   :  { %s97_s23 = spop %96 }
 0x152   :  { %s75_s24 = smul.f32 0.0625, %s97_s23 }
 0x154   :  { %v76_v32 = vstv %s75_s24 }
 0x155   :  { %78 = vst.msk [vmem:[#allocation5] sm:$0x1] %vm77_vm4, %v76_v32 }
 0x156   :  { %89 = dma.vmem_to_hbm [thread:$0]  %s85_s20, 16, %s87_s22, [#allocation4]  }
 0x157   :  { %152 = dma.done.wait [#allocation4], 16  }
 0x158   :  { %153 = vsyncadd [#allocation4], 4294967280 }
 0x159   :  { %94 = vsyncpa [#allocation3], 1 }
 0x15a   :  { %95 = vsyncpa [#allocation4], 1 }

</bundles_post_ra>
